<compile_context>
chip_gen: v5e
topology: v5e:2x2
jax: 0.10.0
libtpu: 0.0.40
codegen_flags: <defaults>
</compile_context>

<pallas_src>
import functools

import jax
import jax.numpy as jnp
from jax import lax
from jax.experimental import pallas as pl
from jax.experimental.pallas import tpu as pltpu


def _round_up(x, m):
    return ((x + m - 1) // m) * m


# --------------------------------------------------------------------------- #
# L2 row-normalization of the embedding table (runs once, before the gather). #
# --------------------------------------------------------------------------- #
def _l2_normalize_kernel(x_ref, o_ref):
    x = x_ref[...].astype(jnp.float32)
    # F.normalize(p=2, dim=1, eps=1e-12): x / max(||x||, 1e-12)
    #   == x * rsqrt(max(||x||^2, 1e-24)); rsqrt runs on the EUP.
    ssq = jnp.sum(x * x, axis=-1, keepdims=True)
    o_ref[...] = x * lax.rsqrt(jnp.maximum(ssq, 1e-24))


def l2_normalize(x, *, block_rows=256):
    n, d = x.shape
    tn = min(_round_up(block_rows, 8), _round_up(n, 8))
    n_pad = _round_up(n, tn)
    if n_pad != n:
        x = jnp.pad(x, ((0, n_pad - n), (0, 0)))
    out = pl.pallas_call(
        _l2_normalize_kernel,
        out_shape=jax.ShapeDtypeStruct((n_pad, d), jnp.float32),
        grid=(n_pad // tn,),
        in_specs=[pl.BlockSpec((tn, d), lambda i: (i, 0))],
        out_specs=pl.BlockSpec((tn, d), lambda i: (i, 0)),
        compiler_params=pltpu.CompilerParams(dimension_semantics=("parallel",)),
    )(x.astype(jnp.float32))
    return out[:n] if n_pad != n else out


# --------------------------------------------------------------------------- #
# Main kernel: row-strip of left vs full resident right.                      #
# --------------------------------------------------------------------------- #
def _infonce_kernel(left_ref, right_ref, out_ref, *, inv_t, n_links, n_pad,
                    subtract_max, mxu_dtype, exp_dtype):
    pid = pl.program_id(0)
    TM, _ = left_ref.shape

    # Left strip is already L2-normalized (wrapper); fold 1/t here so the
    # (TM, Lp) logits strip and the diagonal come out pre-scaled.
    ln = left_ref[...].astype(jnp.float32) * inv_t                   # (TM, D)
    la = ln.astype(mxu_dtype)
    ra = right_ref[...].astype(mxu_dtype)                            # (Lp, D) resident, pre-normalized

    # logits strip = ln @ rn^T : contract D against D (MXU takes the transposed
    # operand natively, no XLU transpose pass).
    logits = lax.dot_general(la, ra, (((1,), (1,)), ((), ())),
                             preferred_element_type=jnp.float32)     # (TM, Lp)

    # Positive-pair logits: elementwise dot with the matching resident right
    # rows [pid*TM, pid*TM + TM) -- no extra input stream, no (TM, Lp) mask.
    start = pl.multiple_of(pid * TM, TM)
    rd = right_ref[pl.ds(start, TM), :].astype(mxu_dtype)            # (TM, D)
    diag = jnp.sum(la.astype(jnp.float32) * rd.astype(jnp.float32),
                   axis=-1, keepdims=True)                           # (TM, 1)

    # logsumexp over the strip. Padded right rows are exact zero vectors, so
    # their logits are exactly 0: correct the exp-sum analytically ((TM,1) op)
    # instead of masking the whole strip with -inf.
    if subtract_max:
        m = jnp.max(logits, axis=-1, keepdims=True)                  # (TM, 1)
        e = jnp.exp((logits - m).astype(exp_dtype)).astype(jnp.float32)
        sumexp = jnp.sum(e, axis=-1, keepdims=True)
        if n_pad:
            sumexp = sumexp - n_pad * jnp.exp((-m).astype(exp_dtype)).astype(jnp.float32)
        lse = m + jnp.log(sumexp)
    else:
        # |logits| <= 1/t is small enough that exp cannot overflow f32.
        e = jnp.exp(logits.astype(exp_dtype)).astype(jnp.float32)
        sumexp = jnp.sum(e, axis=-1, keepdims=True)
        if n_pad:
            sumexp = sumexp - float(n_pad)                           # exp(0) per padded column
        lse = jnp.log(sumexp)

    per_row = lse - diag                                             # (TM, 1) CE per anchor
    if n_pad:
        row = start + lax.broadcasted_iota(jnp.int32, (TM, 1), 0)
        per_row = jnp.where(row < n_links, per_row, 0.0)

    # Per-strip partial sum; reduced (and divided by L) in the wrapper.
    out_ref[...] = jnp.sum(per_row, axis=0, keepdims=True)[None]     # (1, 1, 1)


def infonce_loss(emb, train_links, *, temperature=0.05, block_rows=None,
                 use_bf16_matmul=False, exp_in_bf16=False):
    """Forward pass of InfoNCE_loss. emb: (N, D) float; train_links: (L, 2) int."""
    inv_t = 1.0 / temperature

    # Normalize once (PyTorch order: normalize emb, then gather).
    emb_n = l2_normalize(emb)

    # Data-dependent row gather stays as cheap JAX glue.
    # TODO(synk): for very large L, scalar-prefetch train_links and gather rows
    # in-kernel (pl.Element row index_map) to avoid materializing (L, D) copies.
    left = jnp.take(emb_n, train_links[:, 0], axis=0)                # (L, D)
    right = jnp.take(emb_n, train_links[:, 1], axis=0)               # (L, D)
    L, D = left.shape

    # Row-strip size: 256 fills the v6e/v7x MXU M dim; 128 matches v5-class.
    if block_rows is None:
        try:
            kind = jax.devices()[0].device_kind.lower()
        except Exception:
            kind = ""
        block_rows = 128 if ("v5" in kind or "v4" in kind or "v3" in kind) else 256

    TM = min(_round_up(block_rows, 8), _round_up(L, 8))              # multiple of 8
    if TM >= 128:
        TM = _round_up(TM, 128)                                      # lane-friendly strips
    Lp = _round_up(L, TM)
    if Lp != L:
        pad = ((0, Lp - L), (0, 0))
        left = jnp.pad(left, pad)
        right = jnp.pad(right, pad)                                  # zero rows -> logits exactly 0

    mxu_dtype = jnp.bfloat16 if use_bf16_matmul else jnp.float32
    exp_dtype = jnp.bfloat16 if exp_in_bf16 else jnp.float32
    right_in = right.astype(mxu_dtype) if use_bf16_matmul else right  # bf16 residency halves VMEM

    # Skip the row-max shift when exp(|logits|) cannot overflow f32.
    subtract_max = inv_t > 30.0

    G = Lp // TM

    # VMEM budget derived from the actual buffers (resident right, double-buffered
    # left strip, logits/exp temporaries), capped below physical capacity.
    # TODO(synk): for L large enough that the resident right no longer fits
    # (notably v7x's 64 MiB VMEM), add a column-block grid axis with an online
    # (flash-style) logsumexp carry instead of full residency.
    bytes_r = 2 if use_bf16_matmul else 4
    est = (2 * Lp * D * bytes_r + 2 * TM * D * 4 + 3 * TM * Lp * 4 + (2 << 20))
    vmem_limit = min(max(est, 32 * 1024 * 1024), 100 * 1024 * 1024)
    try:
        vmem_limit = min(vmem_limit,
                         int(pltpu.get_tpu_info().vmem_capacity_bytes * 7 // 8))
    except Exception:
        pass

    kernel = functools.partial(
        _infonce_kernel, inv_t=inv_t, n_links=L, n_pad=Lp - L,
        subtract_max=subtract_max, mxu_dtype=mxu_dtype, exp_dtype=exp_dtype)

    partials = pl.pallas_call(
        kernel,
        out_shape=jax.ShapeDtypeStruct((G, 1, 1), jnp.float32),
        grid_spec=pltpu.PrefetchScalarGridSpec(
            num_scalar_prefetch=0,
            grid=(G,),
            in_specs=[
                pl.BlockSpec((TM, D), lambda i: (i, 0)),             # left row strip
                pl.BlockSpec((Lp, D), lambda i: (0, 0)),             # full right (resident)
            ],
            out_specs=pl.BlockSpec((1, 1, 1), lambda i: (i, 0, 0)),  # per-strip partial sum
        ),
        compiler_params=pltpu.CompilerParams(
            # Independent row strips -> parallel (megacore on v7x).
            dimension_semantics=("parallel",),
            vmem_limit_bytes=vmem_limit,
        ),
    )(left, right_in)

    return jnp.sum(partials) / L                                     # mean reduction


def _infonce_reference(emb, train_links, *, temperature=0.05):
    # Pure-JAX reference of the PyTorch module, for correctness checks.
    emb_n = emb / jnp.maximum(jnp.linalg.norm(emb, axis=-1, keepdims=True), 1e-12)
    left = jnp.take(emb_n, train_links[:, 0], axis=0)
    right = jnp.take(emb_n, train_links[:, 1], axis=0)
    logits = (left @ right.T) / temperature
    labels = jnp.arange(logits.shape[0])
    logp = jax.nn.log_softmax(logits, axis=-1)
    return -jnp.mean(logp[labels, labels])


if __name__ == "__main__":
    key = jax.random.PRNGKey(0)
    k_emb, k_links = jax.random.split(key)

    N, D, L = 24, 32, 12          # N node embeddings of dim D; L training links
    emb = jax.random.normal(k_emb, (N, D), dtype=jnp.float32)
    train_links = jax.random.randint(k_links, (L, 2), 0, N, dtype=jnp.int32)

    ref = _infonce_reference(emb, train_links)

    # Default path (single strip; exercises the padded-column correction, 12 -> 16).
    loss = infonce_loss(emb, train_links)
    jax.block_until_ready(loss)
    assert jnp.allclose(loss, ref, atol=1e-4, rtol=1e-4), (loss, ref)

    # Multi-strip path (grid = 2): per-strip partial sums on the parallel axis.
    loss_multi = infonce_loss(emb, train_links, block_rows=8)
    jax.block_until_ready(loss_multi)
    assert jnp.allclose(loss_multi, ref, atol=1e-4, rtol=1e-4), (loss_multi, ref)

    # Padded rows spread across strips: L=40, TM=16 -> Lp=48, 8 padded rows.
    L2 = 40
    links2 = jax.random.randint(jax.random.PRNGKey(1), (L2, 2), 0, N, dtype=jnp.int32)
    ref2 = _infonce_reference(emb, links2)
    loss2 = infonce_loss(emb, links2, block_rows=16)
    jax.block_until_ready(loss2)
    assert jnp.allclose(loss2, ref2, atol=1e-4, rtol=1e-4), (loss2, ref2)

    # bf16 MXU + bf16 exp perf path: looser tolerance (1/t = 20 amplifies the
    # similarity rounding error before the log).
    loss_bf16 = infonce_loss(emb, train_links, use_bf16_matmul=True, exp_in_bf16=True)
    jax.block_until_ready(loss_bf16)
    assert jnp.allclose(loss_bf16, ref, atol=0.5, rtol=0.1), (loss_bf16, ref)

    print("KERNEL_OK")
</pallas_src>

<mosaic_0001>
module attributes {stable_mosaic.version = 11 : i64} {
  func.func @_l2_normalize_kernel(%arg0: i32, %arg1: memref<24x32xf32, #tpu.memory_space<vmem>>, %arg2: memref<24x32xf32, #tpu.memory_space<vmem>>) attributes {dimension_semantics = [#tpu.dimension_semantics<parallel>], iteration_bounds = array<i64: 1>, scalar_prefetch = 0 : i64, scratch_operands = 0 : i64, tpu.core_type = #tpu.core_type<tc>, window_params = [{transform_indices = @transform_0, window_bounds = array<i64: 24, 32>}, {transform_indices = @transform_1, window_bounds = array<i64: 24, 32>}]} {
    %c0 = arith.constant 0 : index
    %c0_0 = arith.constant 0 : index
    %0 = vector.load %arg1[%c0, %c0_0] : memref<24x32xf32, #tpu.memory_space<vmem>>, vector<24x32xf32>
    %1 = arith.mulf %0, %0 : vector<24x32xf32>
    %cst = arith.constant dense<0.000000e+00> : vector<24xf32>
    %2 = vector.multi_reduction <add>, %1, %cst [1] : vector<24x32xf32> to vector<24xf32>
    %3 = vector.shape_cast %2 : vector<24xf32> to vector<24x1xf32>
    %cst_1 = arith.constant 1.000000e-24 : f32
    %4 = vector.broadcast %cst_1 : f32 to vector<24x1xf32>
    %5 = arith.maximumf %3, %4 : vector<24x1xf32>
    %6 = math.rsqrt %5 : vector<24x1xf32>
    %7 = vector.broadcast %6 : vector<24x1xf32> to vector<24x32xf32>
    %8 = arith.mulf %0, %7 : vector<24x32xf32>
    %c0_2 = arith.constant 0 : index
    %c0_3 = arith.constant 0 : index
    %9 = vector.load %arg2[%c0_2, %c0_3] : memref<24x32xf32, #tpu.memory_space<vmem>>, vector<24x32xf32>
    tpu.vector_store %arg2[%c0_2, %c0_3], %8 {strides = array<i32>} : memref<24x32xf32, #tpu.memory_space<vmem>>, vector<24x32xf32>,
    return
  }
  func.func @transform_0(%arg0: i32) -> (i32, i32) {
    %c0_i32 = arith.constant 0 : i32
    %c0_i32_0 = arith.constant 0 : i32
    return %arg0, %c0_i32 : i32, i32
  }
  func.func @transform_1(%arg0: i32) -> (i32, i32) {
    %c0_i32 = arith.constant 0 : i32
    %c0_i32_0 = arith.constant 0 : i32
    return %arg0, %c0_i32 : i32, i32
  }
}

</mosaic_0001>

<bundles_post_ra>
// kernel: tpu_custom_call.1
= control target key start
LH: loop header
LB: loop body
LE: loop exit
PB: predicated region body
PF: predicated region fallthrough
CT: control target
= control target key end

     0   :  { %6 = vsyncpa [#allocation3], 0  ;;  %s193_s0 = inlined_call_operand.hbm [shape: f32[24,32], index: 0, kind: input, shape index: {}]   ;;  %s194_s1 = inlined_call_operand.hbm [shape: f32[24,32], index: 1, kind: output, shape index: {}]  }
   0x1   :  { %7 = vsyncpa [#allocation4], 0  ;;  %s12_s8 = sshll.u32 %s193_s0, 4  ;;  %s161_s9 = smov [#allocation2]   ;;  %s13_s8 = int_to_ptr.hbm [resolvable:$true] %s12_s8 }
   0x2   :  { %s14_s10 = sshll.u32 %s161_s9, 4  ;;  %s162_s11 = smov 128   ;;  %s15_s10 = int_to_ptr.vmem [resolvable:$true] %s14_s10 }
   0x3   :  { %s163_s12 = smov 8  }
   0x4   :  { %20 = dma.hbm_to_vmem [thread:$0]  %s13_s8, 384, %s15_s10, [#allocation3], %s162_s11, %s162_s11, %s163_s12  }
   0x5   :  { %157 = dma.done.wait [#allocation3], 384  }
   0x6   :  { %158 = vsyncadd [#allocation3], 4294966912  ;;  %v27_v0 = vld [vmem:[#allocation2 + $0x10] sm:$0xff]  ;;  %vm31_vm0 = vcmask 261120   ;;  %v25_v1 = vld [vmem:[#allocation2] sm:$0xff]  ;;  %s164_s0 = smov [#allocation5]  }
   0x7   :  { %v30_v2 = vmul.f32 %v27_v0, %v27_v0  ;;  %v28_v3 = vmul.f32 %v25_v1, %v25_v1  ;;  %v26_v4 = vld [vmem:[#allocation2 + $0x8] sm:$0xff]  ;;  %s84_s13 = sshll.u32 %s164_s0, 4  ;;  %s86_s16 = sshll.u32 %s194_s1, 4  ;;  %s85_s13 = int_to_ptr.vmem [resolvable:$true] %s84_s13  ;;  %s87_s16 = int_to_ptr.hbm [resolvable:$true] %s86_s16 }
   0x8   :  { %v29_v7 = vmul.f32 %v26_v4, %v26_v4 }
   0x9   :  { %v38_v5 = vsel %vm31_vm0, %v30_v2, 0.0  ;;  %v32_v6 = vsel %vm31_vm0, %v28_v3, 0.0 }
   0xa   :  { %39 = vadd.xlane.f32.xlu1 %v38_v5  ;;  %33 = vadd.xlane.f32.xlu0 %v32_v6  ;;  %v35_v8 = vsel %vm31_vm0, %v29_v7, 0.0 }
  0x12   :  { %36 = vadd.xlane.f32.xlu0 %v35_v8 }
  0x7d   :  { %v40_v9 = vpop.xlane.xlu1 %39  ;;  %v34_v10 = vpop.xlane.xlu0 %33 }
  0x7e   :  { %v43_v11 = vmax.f32 %v40_v9, 1e-24  ;;  %v41_v12 = vmax.f32 %v34_v10, 1e-24 }
  0x80   :  { %103 = vrsqrt.f32 %v43_v11  ;;  %vm70_vm1 = vweird.f32 %v43_v11  ;;  %vm50_vm5 = vweird.f32 %v41_v12 }
  0x81   :  { %105 = vrsqrt.f32 %v41_v12 }
  0x85   :  { %v37_v13 = vpop.xlane.xlu0 %36 }
  0x86   :  { %v104_v14 = vpop.eup %103  ;;  %v42_v15 = vmax.f32 %v37_v13, 1e-24 }
  0x87   :  { %v106_v16 = vpop.eup %105  ;;  %v65_v17 = vmul.f32 %v104_v14, %v43_v11  ;;  %vm71_vm2 = vweird.f32 %v104_v14 }
  0x88   :  { %v45_v18 = vmul.f32 %v106_v16, %v41_v12  ;;  %107 = vrsqrt.f32 %v42_v15  ;;  %vm51_vm3 = vweird.f32 %v106_v16  ;;  %vm72_vm4 = vmor %vm70_vm1, %vm71_vm2  ;;  %vm60_vm8 = vweird.f32 %v42_v15 }
  0x89   :  { %v66_v19 = vmul.f32 %v104_v14, %v65_v17  ;;  %vm52_vm6 = vmor %vm50_vm5, %vm51_vm3 }
  0x8a   :  { %v46_v20 = vmul.f32 %v106_v16, %v45_v18 }
  0x8b   :  { %v67_v21 = vmul.f32 0.5, %v66_v19 }
  0x8c   :  { %v47_v22 = vmul.f32 0.5, %v46_v20 }
  0x8d   :  { %v68_v23 = vsub.f32 1.5, %v67_v21 }
  0x8e   :  { %v108_v24 = vpop.eup %107  ;;  %v48_v25 = vsub.f32 1.5, %v47_v22 }
  0x8f   :  { %v69_v26 = vmul.f32 %v104_v14, %v68_v23  ;;  %v55_v27 = vmul.f32 %v108_v24, %v42_v15  ;;  %vm61_vm7 = vweird.f32 %v108_v24 }
  0x90   :  { %v49_v28 = vmul.f32 %v106_v16, %v48_v25  ;;  %vm62_vm9 = vmor %vm60_vm8, %vm61_vm7 }
  0x91   :  { %v73_v29 = vsel %vm72_vm4, %v104_v14, %v69_v26  ;;  %v56_v30 = vmul.f32 %v108_v24, %v55_v27 }
  0x92   :  { %v76_v31 = vmul.f32 %v73_v29, %v27_v0  ;;  %v53_v32 = vsel %vm52_vm6, %v106_v16, %v49_v28 }
  0x93   :  { %v74_v33 = vmul.f32 %v53_v32, %v25_v1  ;;  %v57_v34 = vmul.f32 0.5, %v56_v30 }
  0x94   :  { %79 = vst.msk [vmem:[#allocation5 + $0x10] sm:$0xff] %vm31_vm0, %v76_v31 }
  0x95   :  { %77 = vst.msk [vmem:[#allocation5] sm:$0xff] %vm31_vm0, %v74_v33  ;;  %v58_v35 = vsub.f32 1.5, %v57_v34 }
  0x97   :  { %v59_v36 = vmul.f32 %v108_v24, %v58_v35 }
  0x99   :  { %v63_v37 = vsel %vm62_vm9, %v108_v24, %v59_v36 }
  0x9a   :  { %v75_v38 = vmul.f32 %v63_v37, %v26_v4 }
  0x9c   :  { %78 = vst.msk [vmem:[#allocation5 + $0x8] sm:$0xff] %vm31_vm0, %v75_v38 }
  0x9d   :  { %92 = dma.vmem_to_hbm [thread:$0]  %s85_s13, 384, %s87_s16, [#allocation4], %s162_s11, %s162_s11, %s163_s12  }
  0x9e   :  { %159 = dma.done.wait [#allocation4], 384  }
  0x9f   :  { %160 = vsyncadd [#allocation4], 4294966912 }
  0xa0   :  { %97 = vsyncpa [#allocation3], 1 }
  0xa1   :  { %98 = vsyncpa [#allocation4], 1 }

</bundles_post_ra>
